<compile_context>
chip_gen: v7x
topology: tpu7x:2x2x1
jax: 0.10.0
libtpu: 0.0.40
codegen_flags: <defaults>
</compile_context>

<pallas_src>
import jax
import jax.numpy as jnp
from jax.experimental import pallas as pl
from jax.experimental.pallas import tpu as pltpu


def ode_kernel(z_ref, scalar_ref, f_ref):
    z = z_ref[...]                          # (N, D) f32: one path, whole in VMEM
    N, D = z.shape
    s = scalar_ref[0]                       # learnable scalar (SMEM)

    # ---- interior-row mask from an (N, 1) sublane iota ----------------------
    row = jax.lax.broadcasted_iota(jnp.int32, (N, 1), 0)
    interior = (row > 0) & (row < N - 1)                         # (N, 1) bool

    # ---- analytic gradient of V(row) = sum_j (z_j^2 - 1)^2 ------------------
    # grad[0,:] = grad[-1,:] = 0   (endpoint images are clamped)
    grad = jnp.where(interior, 4.0 * z * (z * z - 1.0), 0.0)     # (N, D)

    # ---- tangent: central difference via XLU rolls (non-negative shifts) ----
    #   roll(z, 1)[i]   == z[i-1]          roll(z, N-1)[i] == z[i+1]
    # roll wraps at the endpoints; those rows are zeroed by the interior mask
    # on the coefficient and on grad, matching the torch module's zero rows.
    z_next = pltpu.roll(z, N - 1, axis=0)
    z_prev = pltpu.roll(z, 1, axis=0)
    tangent = z_next - z_prev                                    # (N, D)

    # ---- lane reductions on the (otherwise idle) MXU ------------------------
    ones = jnp.ones((D, 1), jnp.float32)
    sumsq = jnp.dot(tangent * tangent, ones,
                    preferred_element_type=jnp.float32)          # (N, 1) |t|^2
    gdt = jnp.dot(grad * tangent, ones,
                  preferred_element_type=jnp.float32)            # (N, 1) <g,t>

    # ---- fused projection + forward ----------------------------------------
    #   tau = t/|t|; dot = <g,tau>; parallel = dot*tau
    #   f = -(g - parallel) - s*parallel = (1-s)*<g,t>/|t|^2 * t - g
    # eps guard keeps coincident adjacent images finite (reference would NaN).
    inv = pl.reciprocal(sumsq + 1e-12, approx=False)             # (N, 1)
    coeff = jnp.where(interior, (1.0 - s) * gdt * inv, 0.0)      # (N, 1)

    f_ref[...] = coeff * tangent - grad


def ode_forward(t, z, scalar):
    """Pallas equivalent of ODE.forward(t, z), batched over a leading axis."""
    del t                                    # unused, as in the torch module
    B, N, D = z.shape
    scalar_arr = jnp.reshape(scalar.astype(jnp.float32), (1,))
    block_bytes = N * D * 4
    cost = pl.CostEstimate(
        flops=20 * B * N * D,                # poly grad + fused projection
        transcendentals=B * N,               # one reciprocal per row
        bytes_accessed=2 * B * N * D * 4 + 4,
    )
    return pl.pallas_call(
        ode_kernel,
        grid=(B,),
        out_shape=jax.ShapeDtypeStruct((B, N, D), jnp.float32),
        in_specs=[
            pl.BlockSpec((None, N, D), lambda b: (b, 0, 0)),        # one path
            pl.BlockSpec(memory_space=pltpu.MemorySpace.SMEM),      # scalar
        ],
        out_specs=pl.BlockSpec((None, N, D), lambda b: (b, 0, 0)),
        compiler_params=pltpu.CompilerParams(
            dimension_semantics=("parallel",),
            vmem_limit_bytes=min(32 * 1024 * 1024,
                                 max(4 * 1024 * 1024, 8 * block_bytes)),
        ),
        cost_estimate=cost,
    )(z, scalar_arr)


# ----------------------------- pure-JAX reference ---------------------------
def _potential(z):
    return jnp.sum((z * z - 1.0) ** 2, axis=1)


def _ref_forward_single(z, scalar):
    N, D = z.shape
    grad = jax.grad(lambda zz: jnp.sum(_potential(zz)))(z)
    grad = grad.at[0, :].set(0.0).at[-1, :].set(0.0)
    tangent = z[2:, :] - z[:-2, :]
    norm = jnp.linalg.norm(tangent, axis=1, keepdims=True)
    tau = jnp.concatenate(
        [jnp.zeros((1, D), z.dtype), tangent / norm, jnp.zeros((1, D), z.dtype)],
        axis=0,
    )
    dot = jnp.sum(grad * tau, axis=1, keepdims=True)   # == diag(grad @ tau^T)
    parallel = dot * tau
    perpendicular = grad - parallel
    return -perpendicular - scalar * parallel


def _ref_forward(t, z, scalar):
    del t
    return jax.vmap(lambda zb: _ref_forward_single(zb, scalar))(z)


if __name__ == "__main__":
    key = jax.random.PRNGKey(0)
    B, N, D = 4, 16, 128                 # batch of NEB paths x images x dims
    z = jax.random.normal(key, (B, N, D), dtype=jnp.float32)
    scalar = jnp.float32(0.5)            # deterministic "learnable" parameter
    t = jnp.float32(0.0)                 # unused, kept for ODE interface parity

    f = ode_forward(t, z, scalar)
    f = jax.block_until_ready(f)

    f_ref = _ref_forward(t, z, scalar)
    assert f.shape == (B, N, D) and f.dtype == jnp.float32
    assert jnp.allclose(f, f_ref, atol=1e-3, rtol=1e-3), (
        "mismatch vs pure-JAX reference"
    )
    print("KERNEL_OK")
</pallas_src>

<mosaic_0001>
module attributes {stable_mosaic.version = 11 : i64} {
  func.func @ode_kernel(%arg0: i32, %arg1: memref<1x16x128xf32, #tpu.memory_space<vmem>>, %arg2: memref<1xf32, #tpu.memory_space<smem>>, %arg3: memref<1x16x128xf32, #tpu.memory_space<vmem>>) attributes {dimension_semantics = [#tpu.dimension_semantics<parallel>], iteration_bounds = array<i64: 4>, scalar_prefetch = 0 : i64, scratch_operands = 0 : i64, tpu.core_type = #tpu.core_type<tc>, window_params = [{transform_indices = @transform_0, window_bounds = array<i64: 1, 16, 128>}, {transform_indices = @transform_1, window_bounds = array<i64: 1>}, {transform_indices = @transform_2, window_bounds = array<i64: 1, 16, 128>}]} {
    %c0 = arith.constant 0 : index
    %c0_0 = arith.constant 0 : index
    %c0_1 = arith.constant 0 : index
    %0 = vector.load %arg1[%c0, %c0_0, %c0_1] : memref<1x16x128xf32, #tpu.memory_space<vmem>>, vector<1x16x128xf32>
    %1 = vector.shape_cast %0 : vector<1x16x128xf32> to vector<16x128xf32>
    %c0_2 = arith.constant 0 : index
    %2 = memref.load %arg2[%c0_2] : memref<1xf32, #tpu.memory_space<smem>>
    %3 = tpu.iota {dimensions = array<i32: 0>} : vector<16x1xi32>
    %c0_i32 = arith.constant 0 : i32
    %4 = vector.broadcast %c0_i32 : i32 to vector<16x1xi32>
    %5 = arith.cmpi sgt, %3, %4 : vector<16x1xi32>
    %c15_i32 = arith.constant 15 : i32
    %6 = vector.broadcast %c15_i32 : i32 to vector<16x1xi32>
    %7 = arith.cmpi slt, %3, %6 : vector<16x1xi32>
    %8 = arith.andi %5, %7 : vector<16x1xi1>
    %cst = arith.constant 4.000000e+00 : f32
    %9 = vector.broadcast %cst : f32 to vector<16x128xf32>
    %10 = arith.mulf %9, %1 : vector<16x128xf32>
    %11 = arith.mulf %1, %1 : vector<16x128xf32>
    %cst_3 = arith.constant 1.000000e+00 : f32
    %12 = vector.broadcast %cst_3 : f32 to vector<16x128xf32>
    %13 = arith.subf %11, %12 : vector<16x128xf32>
    %14 = arith.mulf %10, %13 : vector<16x128xf32>
    %cst_4 = arith.constant 0.000000e+00 : f32
    %15 = vector.shape_cast %8 : vector<16x1xi1> to vector<16x1xi1>
    %16 = vector.broadcast %15 : vector<16x1xi1> to vector<16x128xi1>
    %17 = vector.broadcast %cst_4 : f32 to vector<16x128xf32>
    %18 = arith.select %16, %14, %17 : vector<16x128xi1>, vector<16x128xf32>
    %c15_i32_5 = arith.constant 15 : i32
    %19 = tpu.dynamic_rotate %1 by %c15_i32_5 dim 0 : vector<16x128xf32>, i32 -> vector<16x128xf32>
    %c1_i32 = arith.constant 1 : i32
    %20 = tpu.dynamic_rotate %1 by %c1_i32 dim 0 : vector<16x128xf32>, i32 -> vector<16x128xf32>
    %21 = arith.subf %19, %20 : vector<16x128xf32>
    %cst_6 = arith.constant 1.000000e+00 : f32
    %22 = vector.broadcast %cst_6 : f32 to vector<128x1xf32>
    %23 = arith.mulf %21, %21 : vector<16x128xf32>
    %cst_7 = arith.constant dense<0.000000e+00> : vector<16x1xf32>
    %24 = tpu.matmul %23, %22, %cst_7 {dimension_numbers = #tpu.dot_dimension_numbers<[1], [0], [0], [1], [0, 0, 1, 1], [], []>} : vector<16x128xf32>, vector<128x1xf32>, vector<16x1xf32> -> vector<16x1xf32>
    %25 = arith.mulf %18, %21 : vector<16x128xf32>
    %cst_8 = arith.constant dense<0.000000e+00> : vector<16x1xf32>
    %26 = tpu.matmul %25, %22, %cst_8 {dimension_numbers = #tpu.dot_dimension_numbers<[1], [0], [0], [1], [0, 0, 1, 1], [], []>} : vector<16x128xf32>, vector<128x1xf32>, vector<16x1xf32> -> vector<16x1xf32>
    %cst_9 = arith.constant 9.99999996E-13 : f32
    %27 = vector.broadcast %cst_9 : f32 to vector<16x1xf32>
    %28 = arith.addf %24, %27 : vector<16x1xf32>
    %29 = tpu.reciprocal %28 : vector<16x1xf32> -> vector<16x1xf32>
    %cst_10 = arith.constant 1.000000e+00 : f32
    %30 = arith.subf %cst_10, %2 : f32
    %31 = vector.broadcast %30 : f32 to vector<16x1xf32>
    %32 = arith.mulf %31, %26 : vector<16x1xf32>
    %33 = arith.mulf %32, %29 : vector<16x1xf32>
    %cst_11 = arith.constant 0.000000e+00 : f32
    %34 = vector.broadcast %cst_11 : f32 to vector<16x1xf32>
    %35 = arith.select %8, %33, %34 : vector<16x1xi1>, vector<16x1xf32>
    %36 = vector.broadcast %35 : vector<16x1xf32> to vector<16x128xf32>
    %37 = arith.mulf %36, %21 : vector<16x128xf32>
    %38 = arith.subf %37, %18 : vector<16x128xf32>
    %c0_12 = arith.constant 0 : index
    %c0_13 = arith.constant 0 : index
    %c0_14 = arith.constant 0 : index
    %39 = vector.load %arg3[%c0_12, %c0_13, %c0_14] : memref<1x16x128xf32, #tpu.memory_space<vmem>>, vector<1x16x128xf32>
    %40 = vector.shape_cast %39 : vector<1x16x128xf32> to vector<16x128xf32>
    %41 = vector.shape_cast %38 : vector<16x128xf32> to vector<1x16x128xf32>
    tpu.vector_store %arg3[%c0_12, %c0_13, %c0_14], %41 {strides = array<i32>} : memref<1x16x128xf32, #tpu.memory_space<vmem>>, vector<1x16x128xf32>,
    return
  }
  func.func @transform_0(%arg0: i32) -> (i32, i32, i32) {
    %c0_i32 = arith.constant 0 : i32
    %c0_i32_0 = arith.constant 0 : i32
    %c0_i32_1 = arith.constant 0 : i32
    return %arg0, %c0_i32, %c0_i32_0 : i32, i32, i32
  }
  func.func @transform_1(%arg0: i32) -> i32 {
    %c0_i32 = arith.constant 0 : i32
    %c0_i32_0 = arith.constant 0 : i32
    return %c0_i32 : i32
  }
  func.func @transform_2(%arg0: i32) -> (i32, i32, i32) {
    %c0_i32 = arith.constant 0 : i32
    %c0_i32_0 = arith.constant 0 : i32
    %c0_i32_1 = arith.constant 0 : i32
    return %arg0, %c0_i32, %c0_i32_0 : i32, i32, i32
  }
}

</mosaic_0001>

<bundles_post_ra>
// kernel: tpu_custom_call.1
= control target key start
LH: loop header
LB: loop body
LE: loop exit
PB: predicated region body
PF: predicated region fallthrough
CT: control target
= control target key end

     0   :  { %s1027_s0 = inlined_call_operand.hbm [shape: f32[4,16,128], index: 0, kind: input, shape index: {}]   ;;  %s1028_s1 = inlined_call_operand.<no memory space> [shape: f32[1], index: 1, kind: input, shape index: {}]   ;;  %s1029_s2 = inlined_call_operand.hbm [shape: f32[4,16,128], index: 2, kind: output, shape index: {}]  }
   0x1   :  { %7 = sst [smem:[#allocation2]] %s1028_s1 }
   0x2   :  { %8 = vsyncpa [#allocation4], 0 }
   0x3   :  { %10 = vsyncpa [#allocation4 + $0x1], 0 }
   0x4   :  { %11 = vsyncpa [#allocation5], 0 }
   0x5   :  { %13 = vsyncpa [#allocation5 + $0x1], 0  ;;  %s805_s11 = smov 0   ;;  %s807_s12 = smov 0  }
   0x6   :  { %s809_s13 = smov 0   ;;  %s811_s14 = smov 0  }
   0x7 LB: > { %s826_s1 = sadd.s32 4294967295, %s777_s14   ;;  %s468_s15 = sadd.s32 4294967294, %s777_s14   ;;  %s777_s14 = sphi %s811_s14, %s1041_s14   ;;  %s773_s13 = sphi %s809_s13, %s1040_s13   ;;  %s769_s12 = sphi %s807_s12, %s1039_s12   ;;  %s765_s11 = sphi %s805_s11, %s1038_s11  }
   0x8   : > { %s830_s16 = sadd.s32 1, %s777_s14   ;;  %s26_s17 = sadd.s32 1, %s773_s13 }
   0x9   : > { %s23_s18 = ssub.s32 %s777_s14, %s830_s16  ;;  %p33_p0 = scmp.ne.s32.totalorder %s773_s13, %s769_s12 }
   0xa   : > { %p24_p1 = scmp.eq.s32.totalorder %s23_s18, 0  ;;  %p34_p2 = scmp.eq.s32.totalorder %s777_s14, 0 }
   0xb   : > { %p39_p3 = scmp.ne.s32.totalorder %s769_s12, %s765_s11  ;;  %p40_p4 = scmp.eq.s32.totalorder %s826_s1, 0 }
   0xc   : > { %s842_s19 = scalar_select %p24_p1, %s773_s13, %s26_s17  }
   0xd   : > { %p844_p5 = por %p34_p2, %p33_p0  ;;  %p848_p6 = por %p40_p4, %p39_p3 }
   0xe   : > { %p84_p7 = scmp.eq.s32.totalorder %s826_s1, 3  ;;  %p90_p8 = scmp.eq.s32.totalorder %s468_s15, 3 }
   0xf   : > { %p636_p9 = scmp.lt.s32.totalorder %s777_s14, 4  ;;  %s113_s24 = sand.u32 1, %s773_s13  }
  0x10   : > { %p854_p10 = por %p84_p7, %p33_p0  ;;  %p858_p11 = por %p90_p8, %p39_p3 }
  0x11   : > { %s484_s25 = sshll.u32 %s777_s14, 8  ;;  %s471_s26 = sshll.u32 %s113_s24, 4 }
  0x12   : > { %s1033_s22 = scalar_select %p854_p10, 1, 0 }
  0x13   : > { %s1034_s23 = scalar_select %p858_p11, 1, 0 }
  0x14   : > { %s867_s29 = scalar_lea.hbm %s1027_s0, %s484_s25  ;;  %s117_s30 = scalar_lea.vmem [#allocation3], %s471_s26 }
  0x15   : > { %s124_s3 = sshll.u32 %s117_s30, 4  ;;  %p871_p12 = pnand %p636_p9, %p844_p5  ;;  %s875_s3 = int_to_ptr.vmem [resolvable:$true] %s124_s3 }
  0x16   : > { %s877_s5 = scalar_lea.sflag [#allocation4], %s113_s24  ;;  %s681_s6 = scalar_lea.hbm %s867_s29, 256 }
  0x17   : > { %p682_p13 = scmp.ne.s32.totalorder %s867_s29, %s681_s6  ;;  %p683_p0 = pneg %p871_p12 }
  0x18   : > { %s686_s9 = scalar_lea.hbm %s1027_s0, 1024  ;;  %p687_p3 = scmp.lt.u32.totalorder %s867_s29, %s1027_s0 }
  0x19   : > { %p684_p1 = pnand %p683_p0, %p682_p13  ;;  %p688_p4 = scmp.lt.u32.totalorder %s686_s9, %s681_s6 }
  0x1a   : > { %p690_p7 = scmp.lt.u32.totalorder %s681_s6, %s867_s29 }
  0x1b   : > { %p685_p2 = pneg %p684_p1  ;;  %p689_p5 = por %p688_p4, %p687_p3 }
  0x1d   : > { %p691_p8 = por %p690_p7, %p689_p5 }
  0x1f   : > { %p692_p9 = pnand %p691_p8, %p685_p2 }
  0x21   : > { %695 = shalt.err (!%p692_p9)
}
  0x22   : > { %s696_s17 = scalar_lea.vmem %s875_s3, 256  ;;  %s779_s18 = smov [#allocation3]  }
  0x23   : > { %p697_p13 = scmp.ne.s32.totalorder %s875_s3, %s696_s17  ;;  %s701_s20 = sshll.u32 %s779_s18, 4  ;;  %s702_s20 = int_to_ptr.vmem [resolvable:$false] %s701_s20 }
  0x24   : > { %s703_s24 = scalar_lea.vmem %s702_s20, 512  ;;  %p704_p10 = scmp.lt.s32.totalorder %s875_s3, %s702_s20 }
  0x25   : > { %p699_p1 = pnand %p697_p13, %p683_p0  ;;  %p705_p3 = scmp.lt.s32.totalorder %s703_s24, %s696_s17 }
  0x27   : > { %p700_p11 = pneg %p699_p1  ;;  %p706_p4 = por %p705_p3, %p704_p10 }
  0x29   : > { %p707_p5 = pnand %p706_p4, %p700_p11 }
  0x2b   : > { %710 = shalt.err (!%p707_p5)
}
  0x2c   : > { %s780_s25 = smov 128   ;;  %s781_s26 = smov 8  }
  0x2d   : > { %631 = dma.hbm_to_vmem [thread:$0]  (!%p871_p12), %s867_s29, 256, %s875_s3, %s877_s5, %s780_s25, %s780_s25, %s781_s26  }
  0x2e   : > { %p474_p0 = scmp.ge.s32.totalorder %s777_s14, 1  ;;  %p132_p2 = scmp.lt.s32.totalorder %s777_s14, 5 }
  0x30   : > { %p133_p7 = pnand %p474_p0, %p132_p2 }
  0x31   : > { %s908_s27 = sand.u32 (!%p133_p7), 1, %s769_s12  }
  0x32   : > { %136 = sbr.rel (%p133_p7) target bundleno = 471 (0x1d7), region = 28  ;;  %s475_s28 = sshll.u32 (!%p133_p7), %s908_s27, 4 }
  0x33   : > { %s139_s30 = scalar_lea.sflag (!%p133_p7), [#allocation4], %s908_s27  ;;  %s142_s6 = scalar_lea.vmem (!%p133_p7), [#allocation3], %s475_s28 }
  0x39   : > { %756 = dma.done.wait (%p848_p6), %s139_s30, 256  }
  0x3a   : > { %758 = vsyncadd (%p848_p6), %s139_s30, 4294967040  ;;  %v166_v0 = vlaneseq  ;;  %v782_v1 = vmov 1.0|1.0   ;;  %v163_v3 = vld [vmem:[%s142_s6] sm:$0xff]  ;;  %v164_v4 = vld [vmem:[%s142_s6 + $0x8] sm:$0xff]  ;;  %v783_v30 = vmov 0  }
  0x3b   : > { %608 = vmatprep.subr.bf16.mxu1 %v782_v1  ;;  %592 = vmatprep.subr.bf16.mxu0 %v782_v1  ;;  %v189_v5 = vrot.slane %v163_v3, 1  ;;  %v190_v6 = vrot.slane %v164_v4, 1  ;;  %v194_v7 = vrot.slane %v163_v3, 7  ;;  %v195_v8 = vrot.slane %v164_v4, 7  ;;  %s165_s21 = sld [smem:[#allocation2]]  ;;  %s162_s3 = scalar_lea.vmem [#allocation6], %s475_s28 }
  0x3c   : > { %609 = vmatpush3.bf16.msra.mxu1 %v782_v1  ;;  %593 = vmatpush3.bf16.msra.mxu0 %v782_v1  ;;  %v924_v2 = vshrl.u32 %v166_v0, 7  ;;  %v175_v9 = vmul.f32 4.0, %v163_v3  ;;  %v177_v10 = vmul.f32 %v163_v3, %v163_v3  ;;  %v178_v17 = vmul.f32 %v164_v4, %v164_v4  ;;  %s395_s4 = sshll.u32 %s162_s3, 4  ;;  %s485_s5 = sshll.u32 %s826_s1, 8  ;;  %s979_s4 = int_to_ptr.vmem [resolvable:$true] %s395_s4 }
  0x3d   : > { %610 = vmatprep.subr.bf16.mxu1 %v782_v1  ;;  %594 = vmatprep.subr.bf16.mxu0 %v782_v1  ;;  %v176_v20 = vmul.f32 4.0, %v164_v4  ;;  %s984_s9 = scalar_lea.hbm %s1029_s2, %s485_s5  ;;  %s382_s10 = scalar_lea.sflag [#allocation5], %s908_s27 }
  0x3e   : > { %vm191_vm0 = vcmp.lt.s32.totalorder %v924_v2, 7  ;;  %vm196_vm1 = vcmp.lt.s32.totalorder %v924_v2, 1  ;;  %v477_v14 = vadd.f32 -1.0, %v177_v10  ;;  %vm169_vm2 = vcmp.gt.s32.totalorder %v924_v2, 0  ;;  %676 = vset.pattern.permute.xlu0 %v783_v30  ;;  %s711_s15 = scalar_lea.vmem %s979_s4, 256  ;;  %p1036_p10 = scmp.ne.s32.totalorder %s1033_s22, 0 }
  0x3f   : > { %v192_v11 = vsel %vm191_vm0, %v189_v5, %v190_v6  ;;  %v198_v12 = vsel %vm196_vm1, %v195_v8, %v194_v7  ;;  %v478_v21 = vadd.f32 -1.0, %v178_v17  ;;  %v168_v22 = vadd.s32 8, %v924_v2  ;;  %p712_p6 = scmp.ne.s32.totalorder %s979_s4, %s711_s15  ;;  %s784_s1 = smov [#allocation6]  }
  0x40   : > { %611 = vmatpush3.bf16.msra.mxu1 %v782_v1  ;;  %595 = vmatpush3.bf16.msra.mxu0 %v782_v1  ;;  %v940_v13 = vsub.f32 %v192_v11, %v198_v12  ;;  %v181_v16 = vmul.f32 %v477_v14, %v175_v9  ;;  %v193_v23 = vsel %vm191_vm0, %v190_v6, %v189_v5  ;;  %s715_s17 = sshll.u32 %s784_s1, 4  ;;  %s716_s17 = int_to_ptr.vmem [resolvable:$false] %s715_s17 }
  0x41   : > { %612 = vmatprep.subr.bf16.mxu1 %v782_v1  ;;  %596 = vmatprep.subr.bf16.mxu0 %v782_v1  ;;  %v197_v24 = vsel %vm196_vm1, %v194_v7, %v195_v8  ;;  %v182_v25 = vmul.f32 %v478_v21, %v176_v20  ;;  %vm172_vm3 = vcmp.lt.s32.totalorder %v168_v22, 15  ;;  %s357_s29 = ssub.f32 1.0, %s165_s21  ;;  %p713_p11 = pnand %p712_p6, %p1036_p10 }
  0x42   : > { %v201_v15 = vmul.f32 %v940_v13, %v940_v13  ;;  %v187_v18 = vsel %vm169_vm2, %v181_v16, 0.0  ;;  %v200_v26 = vsub.f32 %v193_v23, %v197_v24  ;;  %s717_s18 = scalar_lea.vmem %s716_s17, 512  ;;  %p718_p8 = scmp.lt.s32.totalorder %s979_s4, %s716_s17 }
  0x43   : > { %v203_v19 = vmul.f32 %v940_v13, %v187_v18  ;;  %v188_v27 = vsel %vm172_vm3, %v182_v25, 0.0  ;;  %v358_v37 = vstv %s357_s29  ;;  %p714_p12 = pneg %p713_p11  ;;  %p719_p9 = scmp.lt.s32.totalorder %s717_s18, %s711_s15 }
  0x44   : > { %613 = vmatpush3.bf16.msra.mxu1 %v782_v1  ;;  %597 = vmatpush3.bf16.msra.mxu0 %v782_v1  ;;  %v202_v28 = vmul.f32 %v200_v26, %v200_v26  ;;  %v204_v29 = vmul.f32 %v200_v26, %v188_v27 }
  0x45   : > { %614 = vmatprep.subr.bf16.mxu1 %v782_v1  ;;  %598 = vmatprep.subr.bf16.mxu0 %v782_v1  ;;  %p720_p13 = por %p719_p9, %p718_p8 }
  0x46   : > { %589 = vmatprep.mubr.f32.mxu1 %v201_v15  ;;  %554 = vmatprep.mubr.f32.mxu0 %v203_v19 }
  0x47   : > { %p721_p1 = pnand %p720_p13, %p714_p12 }
  0x48   : > { %615 = vmatpush3.bf16.msra.mxu1 %v782_v1  ;;  %599 = vmatpush3.bf16.msra.mxu0 %v782_v1 }
  0x49   : > { %616 = vmatprep.subr.bf16.mxu1 %v782_v1  ;;  %600 = vmatprep.subr.bf16.mxu0 %v782_v1 }
  0x4c   : > { %617 = vmatpush3.bf16.msra.mxu1 %v782_v1  ;;  %601 = vmatpush3.bf16.msra.mxu0 %v782_v1 }
  0x4d   : > { %618 = vmatprep.subr.bf16.mxu1 %v782_v1  ;;  %602 = vmatprep.subr.bf16.mxu0 %v782_v1 }
  0x50   : > { %619 = vmatpush3.bf16.msra.mxu1 %v782_v1  ;;  %603 = vmatpush3.bf16.msra.mxu0 %v782_v1 }
  0x51   : > { %620 = vmatprep.subr.bf16.mxu1 %v782_v1  ;;  %604 = vmatprep.subr.bf16.mxu0 %v782_v1 }
  0x54   : > { %621 = vmatpush3.bf16.msra.mxu1 %v782_v1  ;;  %605 = vmatpush3.bf16.msra.mxu0 %v782_v1 }
  0x55   : > { %622 = vmatprep.subr.bf16.mxu1 %v782_v1  ;;  %606 = vmatprep.subr.bf16.mxu0 %v782_v1 }
  0x58   : > { %623 = vmatpush3.bf16.msra.mxu1 %v782_v1  ;;  %607 = vmatpush3.bf16.msra.mxu0 %v782_v1 }
  0x5b   : > { %590 = vmatmul.mubr.f32.vlgmr.msra.gmra.mrb[0].mxu1 %v202_v28  ;;  %555 = vmatmul.mubr.f32.vlgmr.msra.gmra.mrb[0].mxu0 %v204_v29 }
 0x12e   : > { %v591_v31 = vpop.f32.mrb[0].mxu1  ;;  %v556_v32 = vpop.f32.mrb[0].mxu0 }
 0x12f   : > { %v352_v33 = vadd.f32 1e-12, %v591_v31  ;;  %v346_v34 = vpop.f32.mrb[1].mxu1  ;;  %v271_v35 = vpop.f32.mrb[1].mxu0  ;;  %v360_v38 = vmul.f32 %v556_v32, %v358_v37 }
 0x130   : > { %v347_v36 = vadd.f32 1e-12, %v346_v34  ;;  %v359_v39 = vmul.f32 %v358_v37, %v271_v35 }
 0x131   : > { %677 = vrcp.f32 %v352_v33 }
 0x132   : > { %679 = vrcp.f32 %v347_v36 }
 0x13b   : > { %v678_v40 = vpop.eup %677 }
 0x13c   : > { %v680_v41 = vpop.eup %679  ;;  %v362_v42 = vmul.f32 %v678_v40, %v360_v38 }
 0x13d   : > { %v361_v43 = vmul.f32 %v680_v41, %v359_v39 }
 0x13e   : > { %v364_v45 = vsel %vm172_vm3, %v362_v42, 0.0 }
 0x13f   : > { %v363_v44 = vsel %vm169_vm2, %v361_v43, 0.0 }
 0x140   : > { %367 = vperm.xlu0 %676, %v363_v44  }
 0x144   : > { %372 = vperm.xlu0 %676, %v364_v45  }
 0x1bf   : > { %v368_v46 = vpop.permute.xlu0 %367 }
 0x1c0   : > { %v375_v47 = vmul.f32 %v368_v46, %v940_v13 }
 0x1c2   : > { %v377_v48 = vsub.f32 %v375_v47, %v187_v18 }
 0x1c3   : > { %v373_v49 = vpop.permute.xlu0 %372 }
 0x1c4   : > { %379 = vst [vmem:[%s162_s3] sm:$0xff] %v377_v48  ;;  %v376_v50 = vmul.f32 %v373_v49, %v200_v26 }
 0x1c6   : > { %v378_v51 = vsub.f32 %v376_v50, %v188_v27 }
 0x1c8   : > { %380 = vst [vmem:[%s162_s3 + $0x8] sm:$0xff] %v378_v51 }
 0x1c9   : > { %724 = shalt.err (!%p721_p1)
}
 0x1ca   : > { %s725_s20 = scalar_lea.hbm %s984_s9, 256  ;;  %s729_s26 = scalar_lea.hbm %s1029_s2, 1024 }
 0x1cb   : > { %p726_p3 = scmp.ne.s32.totalorder %s984_s9, %s725_s20  ;;  %p730_p0 = scmp.lt.u32.totalorder %s984_s9, %s1029_s2 }
 0x1cc   : > { %p731_p2 = scmp.lt.u32.totalorder %s729_s26, %s725_s20  ;;  %p733_p6 = scmp.lt.u32.totalorder %s725_s20, %s984_s9 }
 0x1cd   : > { %p727_p4 = pnand %p726_p3, %p1036_p10 }
 0x1ce   : > { %p732_p7 = por %p731_p2, %p730_p0 }
 0x1cf   : > { %p728_p5 = pneg %p727_p4 }
 0x1d0   : > { %p734_p11 = por %p733_p6, %p732_p7 }
 0x1d2   : > { %p735_p12 = pnand %p734_p11, %p728_p5 }
 0x1d4   : > { %738 = shalt.err (!%p735_p12)
}
 0x1d5   : > { %s785_s6 = smov 128   ;;  %s786_s21 = smov 8  }
 0x1d6   : > { %626 = dma.vmem_to_hbm [thread:$0]  (%p1036_p10), %s979_s4, 256, %s984_s9, %s382_s10, %s785_s6, %s785_s6, %s786_s21  }
 0x1d7 PF: > { %p637_p8 = scmp.ge.s32.totalorder %s777_s14, 2  ;;  %s410_s29 = sand.u32 1, %s765_s11  }
 0x1d8   : > { %p1037_p9 = scmp.ne.s32.totalorder %s1034_s23, 0  ;;  %s411_s3 = scalar_lea.sflag [#allocation5], %s410_s29 }
 0x1da   : > { %p633_p13 = pnand %p637_p8, %p1037_p9 }
 0x1dc   : > { %760 = dma.done.wait (!%p633_p13), %s411_s3, 256  }
 0x1dd   : > { %762 = vsyncadd (!%p633_p13), %s411_s3, 4294967040  ;;  %p16_p1 = scmp.ge.s32.totalorder %s830_s16, 6   ;;  %s1038_s11 = smov %s769_s12 }
 0x1de   : > { %s1039_s12 = smov %s773_s13  ;;  %s1040_s13 = smov %s842_s19 }
 0x1df   : > { %s1041_s14 = smov %s830_s16  ;;  %18 = sbr.rel (!%p16_p1) target bundleno = 7 (0x7), region = 73 }
 0x1e6   :  { %416 = vsyncpa [#allocation4], 1 }
 0x1e7   :  { %418 = vsyncpa [#allocation4 + $0x1], 1 }
 0x1e8   :  { %419 = vsyncpa [#allocation5], 1 }
 0x1e9   :  { %421 = vsyncpa [#allocation5 + $0x1], 1 }

</bundles_post_ra>
